<compile_context>
chip_gen: v6e
topology: v6e:2x2x1
jax: 0.10.0
libtpu: 0.0.40
codegen_flags: <defaults>
</compile_context>

<pallas_src>
import jax
import jax.numpy as jnp
import numpy as np
from jax.experimental import pallas as pl
from jax.experimental.pallas import tpu as pltpu

N = 2          # batch
L = 16         # input length
CIN = 4        # prior_num_filters
COUT = 8       # cur_num_filters
K = 3          # conv_filter_length
SUB = 2        # subsample_length (maxpool kernel + first conv stride)
L_OUT = L // SUB
BN_EPS = 1e-5

# Hard-wired config assumptions -> fail loudly for other block configs.
assert SUB == 2, "parity split / shortcut maxpool hardwired for subsample_length == 2"
assert COUT == 2 * CIN, "zero-padded shortcut assumes channel doubling"
assert K == 3, "per-tap conv accumulation written for kernel size 3"
assert L % SUB == 0

# Columns of the packed per-channel affine block (channels on sublanes).
_S1, _T1, _S2, _T2, _C2 = 0, 1, 2, 3, 4
AFF_COLS = 8


def _tap(a, d):
    """Neighbour tap along the position (lane) axis: b[:, l] = a[:, l + d],
    zeroed at the "same"-padding edge.  d in {-1, +1}.
    One XLU lane rotate + one VPU select (no sublane slices / concats)."""
    n = a.shape[-1]
    rolled = pltpu.roll(a, shift=(-d) % n, axis=1)
    lane = jax.lax.broadcasted_iota(jnp.int32, a.shape, 1)
    edge = 0 if d < 0 else n - 1
    return jnp.where(lane == edge, 0.0, rolled)


def resnet_block_kernel(xe_ref, xo_ref, aff_ref, w1_ref, w2_ref, o_ref):
    """One batch element per grid step.  All arrays f32, positions on lanes.
       xe_ref:(CIN, L_OUT)   channels x even input positions (2l)
       xo_ref:(CIN, L_OUT)   channels x odd  input positions (2l+1)
       aff_ref:(COUT, 8)     packed per-channel affines (cols s1,t1,s2,t2eff,c2)
       w1_ref:(K, COUT, CIN)   conv1 per-tap weight slabs
       w2_ref:(K, COUT, COUT)  conv2 per-tap weight slabs
       o_ref:(COUT, L_OUT)   output channels x output positions (NCL block)."""
    xe = xe_ref[...]
    xo = xo_ref[...]
    aff = aff_ref[...]

    s1 = aff[:CIN, _S1:_S1 + 1]      # (CIN, 1)  BN1 scale
    t1 = aff[:CIN, _T1:_T1 + 1]      # (CIN, 1)  BN1 shift
    s2 = aff[:, _S2:_S2 + 1]         # (COUT, 1) BN2 scale
    t2e = aff[:, _T2:_T2 + 1]        # (COUT, 1) BN2 shift (+ conv1 bias folded)
    c2b = aff[:, _C2:_C2 + 1]        # (COUT, 1) conv2 bias

    # --- shortcut: MaxPool1d(2) over length + ZeroPad1d over channels --------
    short = jnp.maximum(xe, xo)                                        # (CIN, L_OUT)
    short_full = jnp.concatenate([short, jnp.zeros_like(short)], axis=0)

    # --- BN1 (folded, eval mode) + ReLU on both parity streams ---------------
    he = jnp.maximum(xe * s1 + t1, 0.0)
    ho = jnp.maximum(xo * s1 + t1, 0.0)

    # --- Conv1d #1: CIN -> COUT, K=3, stride 2, "same" pad -------------------
    # output slot l reads input positions 2l-1 (tap0), 2l (tap1), 2l+1 (tap2)
    # TODO(synk): cast MXU operands to bf16 on v6e/v7x at real ECG lengths.
    acc = jnp.dot(w1_ref[0], _tap(ho, -1), preferred_element_type=jnp.float32)
    acc = acc + jnp.dot(w1_ref[1], he, preferred_element_type=jnp.float32)
    acc = acc + jnp.dot(w1_ref[2], ho, preferred_element_type=jnp.float32)

    # --- BN2 (conv1 bias absorbed) + ReLU; Dropout == identity (eval) --------
    h1 = jnp.maximum(acc * s2 + t2e, 0.0)                              # (COUT, L_OUT)

    # --- Conv1d #2: COUT -> COUT, K=3, stride 1, "same" pad ------------------
    out = jnp.dot(w2_ref[0], _tap(h1, -1), preferred_element_type=jnp.float32)
    out = out + jnp.dot(w2_ref[1], h1, preferred_element_type=jnp.float32)
    out = out + jnp.dot(w2_ref[2], _tap(h1, +1), preferred_element_type=jnp.float32)

    # --- bias + residual shortcut; single lane-dense whole-block store -------
    o_ref[...] = out + c2b + short_full


def resnet_block(x_ncl, params):
    """x_ncl: (N, CIN, L) float32 (PyTorch NCL). Returns (N, COUT, L_OUT) NCL."""
    g1, be1, m1, v1, w1, c1, g2, be2, m2, v2, w2, c2 = params

    # Fold eval-mode BatchNorm into per-channel scale/shift (tiny glue).
    s1 = g1 / jnp.sqrt(v1 + BN_EPS)
    t1 = be1 - m1 * s1
    s2 = g2 / jnp.sqrt(v2 + BN_EPS)
    t2 = be2 - m2 * s2
    t2_eff = c1 * s2 + t2                        # conv1 bias folded into BN2 shift

    # Pack per-channel affines: rows = channels (sublanes), cols = param kind.
    aff = jnp.zeros((COUT, AFF_COLS), jnp.float32)
    aff = aff.at[:CIN, _S1].set(s1)
    aff = aff.at[:CIN, _T1].set(t1)
    aff = aff.at[:, _S2].set(s2)
    aff = aff.at[:, _T2].set(t2_eff)
    aff = aff.at[:, _C2].set(c2)

    # Per-tap weight slabs: w_taps[k] = W[:, :, k].
    w1_taps = jnp.transpose(w1, (2, 0, 1)).astype(jnp.float32)   # (K, COUT, CIN)
    w2_taps = jnp.transpose(w2, (2, 0, 1)).astype(jnp.float32)   # (K, COUT, COUT)

    # Parity (even/odd position) split for the stride-2 conv: free reshape +
    # two strided slices; keeps channels on sublanes / positions on lanes.
    # TODO(synk): at real ECG lengths fold this into the kernel with stride-2
    # pl.ds lane loads so raw NCL input is consumed in a single HBM pass.
    x4 = x_ncl.reshape(N, CIN, L_OUT, SUB)
    x_even = x4[..., 0]
    x_odd = x4[..., 1]

    # TODO(synk): at real ECG lengths add a length grid ("parallel") with halo
    # index_maps (>=512-lane L_OUT tiles); at L=16 the whole length axis is a
    # single lane tile so only batch is gridded.
    return pl.pallas_call(
        resnet_block_kernel,
        out_shape=jax.ShapeDtypeStruct((N, COUT, L_OUT), jnp.float32),
        grid=(N,),
        in_specs=[
            pl.BlockSpec((None, CIN, L_OUT), lambda n: (n, 0, 0)),
            pl.BlockSpec((None, CIN, L_OUT), lambda n: (n, 0, 0)),
            pl.BlockSpec((COUT, AFF_COLS), lambda n: (0, 0)),       # resident
            pl.BlockSpec((K, COUT, CIN), lambda n: (0, 0, 0)),      # resident
            pl.BlockSpec((K, COUT, COUT), lambda n: (0, 0, 0)),     # resident
        ],
        out_specs=pl.BlockSpec((None, COUT, L_OUT), lambda n: (n, 0, 0)),
        compiler_params=pltpu.CompilerParams(
            dimension_semantics=("parallel",),   # shard batch across TCs (v7x)
            vmem_limit_bytes=32 * 1024 * 1024,
        ),
    )(x_even, x_odd, aff, w1_taps, w2_taps)


def reference_forward(x, params):
    """Pure-numpy mirror of the PyTorch forward (eval mode), NCL layout."""
    x = np.asarray(x, np.float64)
    g1, be1, m1, v1, w1, c1, g2, be2, m2, v2, w2, c2 = [
        np.asarray(p, np.float64) for p in params]

    def bn(x, g, b, m, v):
        return ((x - m[None, :, None]) / np.sqrt(v[None, :, None] + BN_EPS)
                * g[None, :, None] + b[None, :, None])

    def same_pad(x, k):
        in_len = x.shape[-1]
        need = max(0, (in_len - 1) + k - in_len)
        lpad, rpad = need // 2, need - need // 2
        return np.pad(x, ((0, 0), (0, 0), (lpad, rpad)))

    def conv1d(x, w, b, stride):
        n, cin, lin = x.shape
        cout, _, k = w.shape
        lo = (lin - k) // stride + 1
        out = np.zeros((n, cout, lo))
        for l in range(lo):
            seg = x[:, :, l * stride:l * stride + k]           # (n, cin, k)
            out[:, :, l] = np.einsum('nck,ock->no', seg, w) + b
        return out

    short = x.reshape(N, CIN, L_OUT, SUB).max(axis=-1)          # MaxPool1d(2)
    short = np.concatenate([short, np.zeros_like(short)], 1)    # ZeroPad1d

    h = np.maximum(bn(x, g1, be1, m1, v1), 0.0)
    h = conv1d(same_pad(h, K), w1, c1, SUB)
    h = np.maximum(bn(h, g2, be2, m2, v2), 0.0)
    h = conv1d(same_pad(h, K), w2, c2, 1)
    return (h + short).astype(np.float32)


if __name__ == "__main__":
    key = jax.random.PRNGKey(0)
    ks = jax.random.split(key, 13)
    x = jax.random.normal(ks[0], (N, CIN, L), jnp.float32)

    g1 = jax.random.uniform(ks[1], (CIN,), jnp.float32, 0.5, 1.5)
    be1 = jax.random.normal(ks[2], (CIN,), jnp.float32) * 0.1
    m1 = jax.random.normal(ks[3], (CIN,), jnp.float32) * 0.1
    v1 = jax.random.uniform(ks[4], (CIN,), jnp.float32, 0.5, 1.5)
    w1 = jax.random.normal(ks[5], (COUT, CIN, K), jnp.float32) * 0.3
    c1 = jax.random.normal(ks[6], (COUT,), jnp.float32) * 0.1
    g2 = jax.random.uniform(ks[7], (COUT,), jnp.float32, 0.5, 1.5)
    be2 = jax.random.normal(ks[8], (COUT,), jnp.float32) * 0.1
    m2 = jax.random.normal(ks[9], (COUT,), jnp.float32) * 0.1
    v2 = jax.random.uniform(ks[10], (COUT,), jnp.float32, 0.5, 1.5)
    w2 = jax.random.normal(ks[11], (COUT, COUT, K), jnp.float32) * 0.3
    c2 = jax.random.normal(ks[12], (COUT,), jnp.float32) * 0.1

    params = (g1, be1, m1, v1, w1, c1, g2, be2, m2, v2, w2, c2)

    out = jax.block_until_ready(resnet_block(x, params))
    assert out.shape == (N, COUT, L_OUT), out.shape

    ref = reference_forward(np.asarray(x), params)
    np.testing.assert_allclose(np.asarray(out), ref, rtol=1e-4, atol=1e-4)
    print("KERNEL_OK")
</pallas_src>

<mosaic_0001>
module attributes {stable_mosaic.version = 11 : i64} {
  func.func @resnet_block_kernel(%arg0: i32, %arg1: memref<1x4x8xf32, #tpu.memory_space<vmem>>, %arg2: memref<1x4x8xf32, #tpu.memory_space<vmem>>, %arg3: memref<8x8xf32, #tpu.memory_space<vmem>>, %arg4: memref<3x8x4xf32, #tpu.memory_space<vmem>>, %arg5: memref<3x8x8xf32, #tpu.memory_space<vmem>>, %arg6: memref<1x8x8xf32, #tpu.memory_space<vmem>>) attributes {dimension_semantics = [#tpu.dimension_semantics<parallel>], iteration_bounds = array<i64: 2>, scalar_prefetch = 0 : i64, scratch_operands = 0 : i64, tpu.core_type = #tpu.core_type<tc>, window_params = [{transform_indices = @transform_0, window_bounds = array<i64: 1, 4, 8>}, {transform_indices = @transform_1, window_bounds = array<i64: 1, 4, 8>}, {pipeline_mode = #tpu.pipeline_mode<synchronous>, transform_indices = @transform_2, window_bounds = array<i64: 8, 8>}, {pipeline_mode = #tpu.pipeline_mode<synchronous>, transform_indices = @transform_3, window_bounds = array<i64: 3, 8, 4>}, {pipeline_mode = #tpu.pipeline_mode<synchronous>, transform_indices = @transform_4, window_bounds = array<i64: 3, 8, 8>}, {transform_indices = @transform_5, window_bounds = array<i64: 1, 8, 8>}]} {
    %c0 = arith.constant 0 : index
    %c0_0 = arith.constant 0 : index
    %c0_1 = arith.constant 0 : index
    %0 = vector.load %arg1[%c0, %c0_0, %c0_1] : memref<1x4x8xf32, #tpu.memory_space<vmem>>, vector<1x4x8xf32>
    %1 = vector.shape_cast %0 : vector<1x4x8xf32> to vector<4x8xf32>
    %c0_2 = arith.constant 0 : index
    %c0_3 = arith.constant 0 : index
    %c0_4 = arith.constant 0 : index
    %2 = vector.load %arg2[%c0_2, %c0_3, %c0_4] : memref<1x4x8xf32, #tpu.memory_space<vmem>>, vector<1x4x8xf32>
    %3 = vector.shape_cast %2 : vector<1x4x8xf32> to vector<4x8xf32>
    %c0_5 = arith.constant 0 : index
    %c0_6 = arith.constant 0 : index
    %4 = vector.load %arg3[%c0_5, %c0_6] : memref<8x8xf32, #tpu.memory_space<vmem>>, vector<8x8xf32>
    %5 = vector.extract_strided_slice %4 {offsets = [0, 0], sizes = [4, 1], strides = [1, 1]} : vector<8x8xf32> to vector<4x1xf32>
    %6 = vector.extract_strided_slice %4 {offsets = [0, 1], sizes = [4, 1], strides = [1, 1]} : vector<8x8xf32> to vector<4x1xf32>
    %7 = vector.extract_strided_slice %4 {offsets = [0, 2], sizes = [8, 1], strides = [1, 1]} : vector<8x8xf32> to vector<8x1xf32>
    %8 = vector.extract_strided_slice %4 {offsets = [0, 3], sizes = [8, 1], strides = [1, 1]} : vector<8x8xf32> to vector<8x1xf32>
    %9 = vector.extract_strided_slice %4 {offsets = [0, 4], sizes = [8, 1], strides = [1, 1]} : vector<8x8xf32> to vector<8x1xf32>
    %10 = arith.maximumf %1, %3 : vector<4x8xf32>
    %cst = arith.constant 0.000000e+00 : f32
    %11 = vector.broadcast %cst : f32 to vector<4x8xf32>
    %12 = tpu.concatenate %10, %11 in 0 : vector<4x8xf32>, vector<4x8xf32> -> vector<8x8xf32>
    %13 = vector.broadcast %5 : vector<4x1xf32> to vector<4x8xf32>
    %14 = arith.mulf %1, %13 : vector<4x8xf32>
    %15 = vector.broadcast %6 : vector<4x1xf32> to vector<4x8xf32>
    %16 = arith.addf %14, %15 : vector<4x8xf32>
    %cst_7 = arith.constant 0.000000e+00 : f32
    %17 = vector.broadcast %cst_7 : f32 to vector<4x8xf32>
    %18 = arith.maximumf %16, %17 : vector<4x8xf32>
    %19 = vector.broadcast %5 : vector<4x1xf32> to vector<4x8xf32>
    %20 = arith.mulf %3, %19 : vector<4x8xf32>
    %21 = vector.broadcast %6 : vector<4x1xf32> to vector<4x8xf32>
    %22 = arith.addf %20, %21 : vector<4x8xf32>
    %cst_8 = arith.constant 0.000000e+00 : f32
    %23 = vector.broadcast %cst_8 : f32 to vector<4x8xf32>
    %24 = arith.maximumf %22, %23 : vector<4x8xf32>
    %c0_9 = arith.constant 0 : index
    %c0_10 = arith.constant 0 : index
    %c0_11 = arith.constant 0 : index
    %25 = vector.load %arg4[%c0_9, %c0_10, %c0_11] : memref<3x8x4xf32, #tpu.memory_space<vmem>>, vector<1x8x4xf32>
    %26 = vector.shape_cast %25 : vector<1x8x4xf32> to vector<8x4xf32>
    %c1_i32 = arith.constant 1 : i32
    %27 = tpu.dynamic_rotate %24 by %c1_i32 dim 1 : vector<4x8xf32>, i32 -> vector<4x8xf32>
    %28 = tpu.iota {dimensions = array<i32: 1>} : vector<4x8xi32>
    %c0_i32 = arith.constant 0 : i32
    %29 = vector.broadcast %c0_i32 : i32 to vector<4x8xi32>
    %30 = arith.cmpi eq, %28, %29 : vector<4x8xi32>
    %cst_12 = arith.constant 0.000000e+00 : f32
    %31 = vector.broadcast %cst_12 : f32 to vector<4x8xf32>
    %32 = arith.select %30, %31, %27 : vector<4x8xi1>, vector<4x8xf32>
    %cst_13 = arith.constant dense<0.000000e+00> : vector<8x8xf32>
    %33 = tpu.matmul %26, %32, %cst_13 {dimension_numbers = #tpu.dot_dimension_numbers<[1], [0], [0], [1], [0, 0, 1, 1], [], []>} : vector<8x4xf32>, vector<4x8xf32>, vector<8x8xf32> -> vector<8x8xf32>
    %c1 = arith.constant 1 : index
    %c0_14 = arith.constant 0 : index
    %c0_15 = arith.constant 0 : index
    %34 = vector.load %arg4[%c1, %c0_14, %c0_15] : memref<3x8x4xf32, #tpu.memory_space<vmem>>, vector<1x8x4xf32>
    %35 = vector.shape_cast %34 : vector<1x8x4xf32> to vector<8x4xf32>
    %cst_16 = arith.constant dense<0.000000e+00> : vector<8x8xf32>
    %36 = tpu.matmul %35, %18, %cst_16 {dimension_numbers = #tpu.dot_dimension_numbers<[1], [0], [0], [1], [0, 0, 1, 1], [], []>} : vector<8x4xf32>, vector<4x8xf32>, vector<8x8xf32> -> vector<8x8xf32>
    %37 = arith.addf %33, %36 : vector<8x8xf32>
    %c2 = arith.constant 2 : index
    %c0_17 = arith.constant 0 : index
    %c0_18 = arith.constant 0 : index
    %38 = vector.load %arg4[%c2, %c0_17, %c0_18] : memref<3x8x4xf32, #tpu.memory_space<vmem>>, vector<1x8x4xf32>
    %39 = vector.shape_cast %38 : vector<1x8x4xf32> to vector<8x4xf32>
    %cst_19 = arith.constant dense<0.000000e+00> : vector<8x8xf32>
    %40 = tpu.matmul %39, %24, %cst_19 {dimension_numbers = #tpu.dot_dimension_numbers<[1], [0], [0], [1], [0, 0, 1, 1], [], []>} : vector<8x4xf32>, vector<4x8xf32>, vector<8x8xf32> -> vector<8x8xf32>
    %41 = arith.addf %37, %40 : vector<8x8xf32>
    %42 = vector.broadcast %7 : vector<8x1xf32> to vector<8x8xf32>
    %43 = arith.mulf %41, %42 : vector<8x8xf32>
    %44 = vector.broadcast %8 : vector<8x1xf32> to vector<8x8xf32>
    %45 = arith.addf %43, %44 : vector<8x8xf32>
    %cst_20 = arith.constant 0.000000e+00 : f32
    %46 = vector.broadcast %cst_20 : f32 to vector<8x8xf32>
    %47 = arith.maximumf %45, %46 : vector<8x8xf32>
    %c0_21 = arith.constant 0 : index
    %c0_22 = arith.constant 0 : index
    %c0_23 = arith.constant 0 : index
    %48 = vector.load %arg5[%c0_21, %c0_22, %c0_23] : memref<3x8x8xf32, #tpu.memory_space<vmem>>, vector<1x8x8xf32>
    %49 = vector.shape_cast %48 : vector<1x8x8xf32> to vector<8x8xf32>
    %c1_i32_24 = arith.constant 1 : i32
    %50 = tpu.dynamic_rotate %47 by %c1_i32_24 dim 1 : vector<8x8xf32>, i32 -> vector<8x8xf32>
    %51 = tpu.iota {dimensions = array<i32: 1>} : vector<8x8xi32>
    %c0_i32_25 = arith.constant 0 : i32
    %52 = vector.broadcast %c0_i32_25 : i32 to vector<8x8xi32>
    %53 = arith.cmpi eq, %51, %52 : vector<8x8xi32>
    %cst_26 = arith.constant 0.000000e+00 : f32
    %54 = vector.broadcast %cst_26 : f32 to vector<8x8xf32>
    %55 = arith.select %53, %54, %50 : vector<8x8xi1>, vector<8x8xf32>
    %cst_27 = arith.constant dense<0.000000e+00> : vector<8x8xf32>
    %56 = tpu.matmul %49, %55, %cst_27 {dimension_numbers = #tpu.dot_dimension_numbers<[1], [0], [0], [1], [0, 0, 1, 1], [], []>} : vector<8x8xf32>, vector<8x8xf32>, vector<8x8xf32> -> vector<8x8xf32>
    %c1_28 = arith.constant 1 : index
    %c0_29 = arith.constant 0 : index
    %c0_30 = arith.constant 0 : index
    %57 = vector.load %arg5[%c1_28, %c0_29, %c0_30] : memref<3x8x8xf32, #tpu.memory_space<vmem>>, vector<1x8x8xf32>
    %58 = vector.shape_cast %57 : vector<1x8x8xf32> to vector<8x8xf32>
    %cst_31 = arith.constant dense<0.000000e+00> : vector<8x8xf32>
    %59 = tpu.matmul %58, %47, %cst_31 {dimension_numbers = #tpu.dot_dimension_numbers<[1], [0], [0], [1], [0, 0, 1, 1], [], []>} : vector<8x8xf32>, vector<8x8xf32>, vector<8x8xf32> -> vector<8x8xf32>
    %60 = arith.addf %56, %59 : vector<8x8xf32>
    %c2_32 = arith.constant 2 : index
    %c0_33 = arith.constant 0 : index
    %c0_34 = arith.constant 0 : index
    %61 = vector.load %arg5[%c2_32, %c0_33, %c0_34] : memref<3x8x8xf32, #tpu.memory_space<vmem>>, vector<1x8x8xf32>
    %62 = vector.shape_cast %61 : vector<1x8x8xf32> to vector<8x8xf32>
    %c7_i32 = arith.constant 7 : i32
    %63 = tpu.dynamic_rotate %47 by %c7_i32 dim 1 : vector<8x8xf32>, i32 -> vector<8x8xf32>
    %64 = tpu.iota {dimensions = array<i32: 1>} : vector<8x8xi32>
    %c7_i32_35 = arith.constant 7 : i32
    %65 = vector.broadcast %c7_i32_35 : i32 to vector<8x8xi32>
    %66 = arith.cmpi eq, %64, %65 : vector<8x8xi32>
    %cst_36 = arith.constant 0.000000e+00 : f32
    %67 = vector.broadcast %cst_36 : f32 to vector<8x8xf32>
    %68 = arith.select %66, %67, %63 : vector<8x8xi1>, vector<8x8xf32>
    %cst_37 = arith.constant dense<0.000000e+00> : vector<8x8xf32>
    %69 = tpu.matmul %62, %68, %cst_37 {dimension_numbers = #tpu.dot_dimension_numbers<[1], [0], [0], [1], [0, 0, 1, 1], [], []>} : vector<8x8xf32>, vector<8x8xf32>, vector<8x8xf32> -> vector<8x8xf32>
    %70 = arith.addf %60, %69 : vector<8x8xf32>
    %71 = vector.broadcast %9 : vector<8x1xf32> to vector<8x8xf32>
    %72 = arith.addf %70, %71 : vector<8x8xf32>
    %73 = arith.addf %72, %12 : vector<8x8xf32>
    %c0_38 = arith.constant 0 : index
    %c0_39 = arith.constant 0 : index
    %c0_40 = arith.constant 0 : index
    %74 = vector.load %arg6[%c0_38, %c0_39, %c0_40] : memref<1x8x8xf32, #tpu.memory_space<vmem>>, vector<1x8x8xf32>
    %75 = vector.shape_cast %74 : vector<1x8x8xf32> to vector<8x8xf32>
    %76 = vector.shape_cast %73 : vector<8x8xf32> to vector<1x8x8xf32>
    tpu.vector_store %arg6[%c0_38, %c0_39, %c0_40], %76 {strides = array<i32>} : memref<1x8x8xf32, #tpu.memory_space<vmem>>, vector<1x8x8xf32>,
    return
  }
  func.func @transform_0(%arg0: i32) -> (i32, i32, i32) {
    %c0_i32 = arith.constant 0 : i32
    %c0_i32_0 = arith.constant 0 : i32
    %c0_i32_1 = arith.constant 0 : i32
    return %arg0, %c0_i32, %c0_i32_0 : i32, i32, i32
  }
  func.func @transform_1(%arg0: i32) -> (i32, i32, i32) {
    %c0_i32 = arith.constant 0 : i32
    %c0_i32_0 = arith.constant 0 : i32
    %c0_i32_1 = arith.constant 0 : i32
    return %arg0, %c0_i32, %c0_i32_0 : i32, i32, i32
  }
  func.func @transform_2(%arg0: i32) -> (i32, i32) {
    %c0_i32 = arith.constant 0 : i32
    %c0_i32_0 = arith.constant 0 : i32
    %c0_i32_1 = arith.constant 0 : i32
    return %c0_i32, %c0_i32_0 : i32, i32
  }
  func.func @transform_3(%arg0: i32) -> (i32, i32, i32) {
    %c0_i32 = arith.constant 0 : i32
    %c0_i32_0 = arith.constant 0 : i32
    %c0_i32_1 = arith.constant 0 : i32
    %c0_i32_2 = arith.constant 0 : i32
    return %c0_i32, %c0_i32_0, %c0_i32_1 : i32, i32, i32
  }
  func.func @transform_4(%arg0: i32) -> (i32, i32, i32) {
    %c0_i32 = arith.constant 0 : i32
    %c0_i32_0 = arith.constant 0 : i32
    %c0_i32_1 = arith.constant 0 : i32
    %c0_i32_2 = arith.constant 0 : i32
    return %c0_i32, %c0_i32_0, %c0_i32_1 : i32, i32, i32
  }
  func.func @transform_5(%arg0: i32) -> (i32, i32, i32) {
    %c0_i32 = arith.constant 0 : i32
    %c0_i32_0 = arith.constant 0 : i32
    %c0_i32_1 = arith.constant 0 : i32
    return %arg0, %c0_i32, %c0_i32_0 : i32, i32, i32
  }
}

</mosaic_0001>

<bundles_post_ra>
// kernel: tpu_custom_call.1
= control target key start
LH: loop header
LB: loop body
LE: loop exit
PB: predicated region body
PF: predicated region fallthrough
CT: control target
= control target key end

     0   :  { %10 = vsyncpa [#allocation3], 0  ;;  %s1333_s0 = inlined_call_operand.vmem [shape: f32[2,4,8], index: 0, kind: input, shape index: {}]   ;;  %s1334_s1 = inlined_call_operand.vmem [shape: f32[2,4,8], index: 1, kind: input, shape index: {}]   ;;  %s1335_s2 = inlined_call_operand.hbm [shape: f32[8,8], index: 2, kind: input, shape index: {}]   ;;  %s1336_s3 = inlined_call_operand.vmem [shape: f32[3,8,4], index: 3, kind: input, shape index: {}]   ;;  %s1337_s4 = inlined_call_operand.vmem [shape: f32[3,8,8], index: 4, kind: input, shape index: {}]   ;;  %s1338_s5 = inlined_call_operand.hbm [shape: f32[2,8,8], index: 5, kind: output, shape index: {}]  }
   0x1   :  { %11 = vsyncpa [#allocation4], 0 }
   0x2   :  { %13 = vsyncpa [#allocation4 + $0x1], 0  ;;  %s1151_s18 = smov 0   ;;  %s1153_s19 = smov 0  }
   0x3   :  { %s1155_s20 = smov 0   ;;  %s1157_s21 = smov 0  }
   0x4 LB: > { %s1172_s22 = sadd.s32 4294967295, %s1107_s21   ;;  %s878_s23 = sadd.s32 4294967294, %s1107_s21   ;;  %s1107_s21 = sphi %s1157_s21, %s1346_s21   ;;  %s1103_s20 = sphi %s1155_s20, %s1345_s20   ;;  %s1099_s19 = sphi %s1153_s19, %s1344_s19   ;;  %s1095_s18 = sphi %s1151_s18, %s1343_s18  }
   0x5   : > { %s1176_s24 = sadd.s32 1, %s1107_s21   ;;  %s141_s25 = sadd.s32 1, %s1103_s20 }
   0x6   : > { %s138_s26 = ssub.s32 %s1107_s21, %s1176_s24  ;;  %p151_p0 = scmp.ne.s32.totalorder %s1103_s20, %s1099_s19 }
   0x7   : > { %p139_p1 = scmp.eq.s32.totalorder %s138_s26, 0  ;;  %p152_p2 = scmp.eq.s32.totalorder %s1172_s22, 1 }
   0x8   : > { %p157_p3 = scmp.ne.s32.totalorder %s1099_s19, %s1095_s18  ;;  %p158_p4 = scmp.eq.s32.totalorder %s878_s23, 1 }
   0x9   : > { %s1187_s27 = scalar_select %p139_p1, %s1103_s20, %s141_s25  }
   0xa   : > { %p1189_p5 = por %p152_p2, %p151_p0  ;;  %p1193_p6 = por %p158_p4, %p157_p3 }
   0xb   : > { %p879_p7 = scmp.ge.s32.totalorder %s1107_s21, 1  ;;  %p165_p8 = scmp.lt.s32.totalorder %s1107_s21, 3 }
   0xc   : > { %s1340_s29 = scalar_select %p1193_p6, 1, 0 }
   0xd   : > { %p965_p9 = scmp.eq.s32.totalorder %s1172_s22, 0  ;;  %p1200_p10 = pnand %p879_p7, %p165_p8 }
   0xe   : > { %s1109_s6 = smov [#allocation2]  }
   0xf   : > { %s178_s7 = sshll.u32 %s1109_s6, 4  ;;  %p957_p11 = pneg %p1200_p10  ;;  %s179_s7 = int_to_ptr.vmem [resolvable:$true] %s178_s7 }
  0x10   : > { %s1028_s8 = scalar_lea.vmem %s179_s7, 128  ;;  %p1036_p3 = scmp.lt.s32.totalorder %s179_s7, %s179_s7 }
  0x11   : > { %p958_p12 = pnand %p965_p9, %p957_p11  ;;  %p1029_p0 = scmp.ne.s32.totalorder %s179_s7, %s1028_s8 }
  0x12   : > { %p1037_p4 = scmp.lt.s32.totalorder %s1028_s8, %s1028_s8 }
  0x13   : > { %p1019_p13 = pneg %p958_p12 }
  0x14   : > { %p1038_p6 = por %p1037_p4, %p1036_p3 }
  0x15   : > { %p1031_p1 = pnand %p1029_p0, %p1019_p13 }
  0x17   : > { %p1032_p2 = pneg %p1031_p1 }
  0x19   : > { %p1039_p7 = pnand %p1038_p6, %p1032_p2 }
  0x1b   : > { %1042 = shalt.err (!%p1039_p7)
}
  0x1c   : > { %960 = dma.hbm_to_vmem [thread:$0]  (!%p958_p12), %s1335_s2, 128, %s179_s7, [#allocation3]  }
  0x1d   : > { %211 = sbr.rel (%p1200_p10) target bundleno = 1284 (0x504), region = 40 }
  0x22   : > { %1086 = dma.done.wait (%p965_p9), [#allocation3], 128  }
  0x23   : > { %1088 = vsyncadd (%p965_p9), [#allocation3], 4294967168  ;;  %v1110_v0 = vmov 0   ;;  %v1217_v1 = vld [vmem:[#allocation2] sm:$0xff]  ;;  %v1111_v2 = vmov 1   ;;  %v1112_v3 = vmov 0.0   ;;  %v279_v24 = vlaneseq }
  0x24   : > { %1011 = vset.pattern.permute.xlu0 %v1110_v0  ;;  %921 = vmatprep.subr.mxu0 %v1112_v3  ;;  %vm1113_vm0 = vmmov 0   ;;  %p242_p6 = scmp.lt.s32.totalorder %s1172_s22, 1  ;;  %vm254_vm1 = vcmask 1043456   ;;  %v887_v14 = vld [vmem:[%s1336_s3 + $0x8] sm:$0xff]  ;;  %vm289_vm2 = vcmask 31744   ;;  %s1114_s30 = smov 8  }
  0x25   : > { %258 = vperm.xlu0 %1011, %v1217_v1   ;;  %926 = vmatprep.subr.mxu1 %v1112_v3  ;;  %vm272_vm3 = vcmask 1047616   ;;  %v892_v17 = vld [vmem:[%s1336_s3 + $0x10] sm:$0xff]  ;;  %v1115_v19 = vmov 2   ;;  %v1116_v20 = vmov 3   ;;  %s1117_s8 = smov 121   ;;  %v280_v25 = vand.u32 127, %v279_v24 }
  0x26   : > { %923 = vmatprep.mubr.msk.f32.mxu0 %vm1113_vm0, %v1112_v3  ;;  %928 = vmatprep.mubr.msk.f32.mxu1 %vm1113_vm0, %v1112_v3  ;;  %s243_s11 = scalar_select %p242_p6, %s1172_s22, 1  ;;  %v271_v27 = vld [vmem:[%s1336_s3] sm:$0xff]  ;;  %v895_v42 = vld [vmem:[%s1337_s4 + $0x8] sm:$0xff]  ;;  %vm546_vm5 = vcmask 64512   ;;  %v1118_v43 = vmov 4   ;;  %v900_v47 = vld [vmem:[%s1337_s4 + $0x10] sm:$0xff] }
  0x27   : > { %1014 = vset.pattern.permute.xlu1 %v1116_v20  ;;  %vm281_vm4 = vcmp.eq.s32.totalorder %v280_v25, 0  ;;  %s1119_s13 = smov 127   ;;  %vm908_vm7 = vcmp.ne.s32.totalorder %v280_v25, 7  ;;  %v532_v46 = vld [vmem:[%s1337_s4] sm:$0xff]  ;;  %s905_s26 = sshll.u32 %s1172_s22, 7 }
  0x28   : > { %s885_s12 = sshll.u32 %s243_s11, 2  ;;  %vm897_vm6 = vmneg %vm281_vm4  ;;  %s793_s9 = scalar_lea.hbm %s1338_s5, %s905_s26 }
  0x29   : > { %1012 = vset.pattern.permute.xlu0 %v1111_v2  ;;  %s245_s15 = scalar_lea.vmem %s1333_s0, %s885_s12  ;;  %s249_s23 = scalar_lea.vmem %s1334_s1, %s885_s12 }
  0x2a   : > { %263 = vperm.xlu0 %1012, %v1217_v1   ;;  %v1235_v5 = vld [vmem:[%s245_s15] sm:$0xf]  ;;  %s1120_s12 = smov [#allocation5]  }
  0x2b   : > { %v1237_v6 = vld [vmem:[%s249_s23] sm:$0xf]  ;;  %s239_s23 = sand.u32 1, %s1099_s19  }
  0x2c   : > { %s884_s25 = sshll.u32 %s239_s23, 3  ;;  %v253_v52 = vmax.f32 %v1235_v5, %v1237_v6  ;;  %s782_s10 = scalar_lea.sflag [#allocation4], %s239_s23 }
  0x2e   : > { %1013 = vset.pattern.permute.xlu0 %v1115_v19  ;;  %v255_v60 = vsel %vm254_vm1, %v253_v52, 0.0 }
  0x2f   : > { %522 = vperm.xlu0 %1013, %v1217_v1  }
  0x33   : > { %1016 = vset.pattern.permute.xlu0 %v1118_v43 }
  0xa0   : > { %v259_v4 = vpop.permute.xlu0 %258 }
  0xa1   : > { %v261_v7 = vmul.f32 %v259_v4, %v1235_v5  ;;  %v268_v8 = vmul.f32 %v259_v4, %v1237_v6 }
  0xa5   : > { %v264_v9 = vpop.permute.xlu0 %263 }
  0xa6   : > { %v266_v10 = vadd.f32 %v264_v9, %v261_v7  ;;  %v269_v11 = vadd.f32 %v268_v8, %v264_v9 }
  0xa8   : > { %v267_v12 = vmax.f32 %v266_v10, 0.0  ;;  %v270_v13 = vmax.f32 %v269_v11, 0.0 }
  0xaa   : > { %273 = vrot.lane.b32.xlu1 %v270_v13, %s1114_s30  ;;  %922 = vmatpush3.msk.msra.mxu0 %vm254_vm1, %v267_v12  ;;  %v523_v34 = vpop.permute.xlu0 %522 }
  0xab   : > { %931 = vmatprep.subr.mxu0 %v1112_v3  ;;  %924 = vmatmul.mubr.msk.f32.vlgmr.msra.gmra.mxu0 %vm289_vm2, %v887_v14 }
  0xac   : > { %932 = vmatpush3.msk.msra.mxu0 %vm254_vm1, %v270_v13  ;;  %933 = vmatprep.mubr.msk.f32.mxu0 %vm1113_vm0, %v1112_v3 }
  0xad   : > { %941 = vmatprep.subr.mxu0 %v1112_v3 }
  0xaf   : > { %934 = vmatmul.mubr.msk.f32.vlgmr.msra.gmra.mxu0 %vm289_vm2, %v892_v17 }
  0xb0   : > { %943 = vmatprep.mubr.msk.f32.mxu0 %vm1113_vm0, %v1112_v3 }
 0x11c   : > { %v274_v15 = vpop.permute.xlu1 %273 }
 0x11d   : > { %v275_v16 = vsel %vm272_vm3, %v274_v15, %v270_v13 }
 0x11e   : > { %276 = vrot.lane.b32.xlu1 %v275_v16, %s1114_s30 }
 0x16b   : > { %v362_v18 = vpop.f32.mrf.mxu0 }
 0x16d   : > { %v925_v21 = vpop.f32.mrf.mxu0 }
 0x16f   : > { %v516_v29 = vpop.f32.mrf.mxu0 }
 0x171   : > { %v935_v30 = vpop.f32.mrf.mxu0 }
 0x190   : > { %v277_v22 = vpop.permute.xlu1 %276 }
 0x191   : > { %v278_v23 = vsel %vm272_vm3, %v277_v22, %v270_v13 }
 0x192   : > { %283 = vrot.lane.b32.xlu1 %v278_v23, %s1117_s8 }
 0x196   : > { %527 = vperm.xlu1 %1014, %v1217_v1  }
 0x19a   : > { %1015 = vset.pattern.permute.xlu1 %v1118_v43 }
 0x204   : > { %v284_v26 = vpop.permute.xlu1 %283 }
 0x205   : > { %v286_v28 = vsel %vm281_vm4, 0.0, %v284_v26 }
 0x206   : > { %927 = vmatpush3.msk.msra.mxu1 %vm254_vm1, %v286_v28 }
 0x207   : > { %929 = vmatmul.mubr.msk.f32.vlgmr.msra.gmra.mxu1 %vm289_vm2, %v271_v27  ;;  %936 = vmatprep.subr.mxu1 %v1112_v3 }
 0x208   : > { %938 = vmatprep.mubr.msk.f32.mxu1 %vm1113_vm0, %v1112_v3 }
 0x211   : > { %v528_v36 = vpop.permute.xlu1 %527 }
 0x2c7   : > { %v438_v31 = vpop.f32.mrf.mxu1 }
 0x2c8   : > { %v439_v32 = vadd.f32 %v438_v31, %v362_v18 }
 0x2c9   : > { %v930_v33 = vpop.f32.mrf.mxu1 }
 0x2ca   : > { %v520_v35 = vadd.f32 %v516_v29, %v439_v32 }
 0x2cc   : > { %v525_v37 = vmul.f32 %v523_v34, %v520_v35 }
 0x2ce   : > { %v530_v38 = vadd.f32 %v528_v36, %v525_v37 }
 0x2d0   : > { %v531_v39 = vmax.f32 %v530_v38, 0.0 }
 0x2d2   : > { %533 = vrot.lane.b32.xlu1 %v531_v39, %s1114_s30  ;;  %937 = vmatpush3.msra.mxu1 %v531_v39 }
 0x2d3   : > { %946 = vmatprep.subr.mxu1 %v1112_v3  ;;  %939 = vmatmul.mubr.msk.f32.vlgmr.msra.gmra.mxu1 %vm546_vm5, %v895_v42 }
 0x2d4   : > { %948 = vmatprep.mubr.msk.f32.mxu1 %vm1113_vm0, %v1112_v3 }
 0x344   : > { %v534_v40 = vpop.permute.xlu1 %533 }
 0x345   : > { %v535_v41 = vsel %vm272_vm3, %v534_v40, %v531_v39 }
 0x346   : > { %536 = vrot.lane.b32.xlu0 %v535_v41, %s1114_s30  ;;  %s241_s30 = scalar_lea.vmem [#allocation5], %s884_s25 }
 0x347   : > { %s795_s6 = sshll.u32 %s241_s30, 4  ;;  %s796_s6 = int_to_ptr.vmem [resolvable:$true] %s795_s6 }
 0x348   : > { %s1043_s11 = scalar_lea.vmem %s796_s6, 128 }
 0x349   : > { %p1044_p8 = scmp.ne.s32.totalorder %s796_s6, %s1043_s11 }
 0x34b   : > { %p1045_p9 = pnand %p1044_p8, %p1189_p5 }
 0x34d   : > { %p1046_p10 = pneg %p1045_p9 }
 0x393   : > { %v616_v50 = vpop.f32.mrf.mxu1 }
 0x395   : > { %v940_v51 = vpop.f32.mrf.mxu1 }
 0x3b8   : > { %v537_v44 = vpop.permute.xlu0 %536 }
 0x3b9   : > { %v538_v45 = vsel %vm272_vm3, %v537_v44, %v531_v39 }
 0x3ba   : > { %696 = vrot.lane.b32.xlu0 %v538_v45, %s1119_s13  ;;  %540 = vrot.lane.b32.xlu1 %v538_v45, %s1117_s8  ;;  %s1047_s13 = sshll.u32 %s1120_s12, 4  ;;  %s1048_s13 = int_to_ptr.vmem [resolvable:$false] %s1047_s13 }
 0x3bb   : > { %s1049_s22 = scalar_lea.vmem %s1048_s13, 256  ;;  %p1050_p11 = scmp.lt.s32.totalorder %s796_s6, %s1048_s13 }
 0x3bc   : > { %p1051_p12 = scmp.lt.s32.totalorder %s1049_s22, %s1043_s11 }
 0x3be   : > { %775 = vperm.xlu1 %1015, %v1217_v1   ;;  %p1052_p13 = por %p1051_p12, %p1050_p11 }
 0x3c0   : > { %p1053_p0 = pnand %p1052_p13, %p1046_p10 }
 0x42c   : > { %v697_v48 = vpop.permute.xlu0 %696  ;;  %v541_v49 = vpop.permute.xlu1 %540 }
 0x42d   : > { %942 = vmatpush3.msk.msra.mxu0 %vm897_vm6, %v541_v49  ;;  %947 = vmatpush3.msk.msra.mxu1 %vm908_vm7, %v697_v48 }
 0x42e   : > { %944 = vmatmul.mubr.msk.f32.vlgmr.msra.gmra.mxu0 %vm546_vm5, %v532_v46  ;;  %949 = vmatmul.mubr.msk.f32.vlgmr.msra.gmra.mxu1 %vm546_vm5, %v900_v47 }
 0x439   : > { %v776_v56 = vpop.permute.xlu1 %775 }
 0x4ee   : > { %v689_v53 = vpop.f32.mrf.mxu0  ;;  %v769_v54 = vpop.f32.mrf.mxu1 }
 0x4ef   : > { %v690_v55 = vadd.f32 %v689_v53, %v616_v50 }
 0x4f0   : > { %v945_v57 = vpop.f32.mrf.mxu0  ;;  %v950_v58 = vpop.f32.mrf.mxu1 }
 0x4f1   : > { %v773_v59 = vadd.f32 %v769_v54, %v690_v55 }
 0x4f3   : > { %v778_v61 = vadd.f32 %v776_v56, %v773_v59 }
 0x4f5   : > { %v779_v62 = vadd.f32 %v778_v61, %v255_v60 }
 0x4f7   : > { %780 = vst.msk [vmem:[%s241_s30] sm:$0xff] %vm546_vm5, %v779_v62 }
 0x4f8   : > { %1056 = shalt.err (!%p1053_p0)
}
 0x4f9   : > { %s1057_s14 = scalar_lea.hbm %s793_s9, 128  ;;  %s1061_s17 = scalar_lea.hbm %s1338_s5, 256 }
 0x4fa   : > { %p1058_p1 = scmp.ne.s32.totalorder %s793_s9, %s1057_s14  ;;  %p1062_p4 = scmp.lt.s32.totalorder %s793_s9, %s1338_s5 }
 0x4fb   : > { %p1063_p7 = scmp.lt.s32.totalorder %s1061_s17, %s1057_s14 }
 0x4fc   : > { %p1059_p2 = pnand %p1058_p1, %p1189_p5 }
 0x4fd   : > { %p1064_p6 = por %p1063_p7, %p1062_p4 }
 0x4fe   : > { %p1060_p3 = pneg %p1059_p2 }
 0x500   : > { %p1065_p8 = pnand %p1064_p6, %p1060_p3 }
 0x502   : > { %1068 = shalt.err (!%p1065_p8)
}
 0x503   : > { %955 = dma.vmem_to_hbm [thread:$0]  (%p1189_p5), %s796_s6, 128, %s793_s9, %s782_s10  }
 0x504 PF: > { %p967_p9 = scmp.ge.s32.totalorder %s1107_s21, 2  ;;  %s807_s26 = sand.u32 1, %s1095_s18  }
 0x505   : > { %p1342_p10 = scmp.ne.s32.totalorder %s1340_s29, 0  ;;  %s808_s30 = scalar_lea.sflag [#allocation4], %s807_s26 }
 0x507   : > { %p962_p11 = pnand %p967_p9, %p1342_p10 }
 0x509   : > { %p963_p12 = pneg %p962_p11 }
 0x50b   : > { %1090 = dma.done.wait (%p963_p12), %s808_s30, 128  }
 0x50c   : > { %1092 = vsyncadd (%p963_p12), %s808_s30, 4294967168  ;;  %p16_p13 = scmp.ge.s32.totalorder %s1176_s24, 4   ;;  %s1343_s18 = smov %s1099_s19 }
 0x50d   : > { %s1344_s19 = smov %s1103_s20  ;;  %s1345_s20 = smov %s1187_s27 }
 0x50e   : > { %s1346_s21 = smov %s1176_s24  ;;  %18 = sbr.rel (!%p16_p13) target bundleno = 4 (0x4), region = 87 }
 0x513   :  { %813 = vsyncpa [#allocation3], 1 }
 0x514   :  { %815 = vsyncpa [#allocation3 + $0x1], 1 }
 0x515   :  { %816 = vsyncpa [#allocation4], 1 }
 0x516   :  { %818 = vsyncpa [#allocation4 + $0x1], 1 }

</bundles_post_ra>
